<compile_context>
chip_gen: v7x
topology: tpu7x:2x2x1
jax: 0.10.0
libtpu: 0.0.40
codegen_flags: <defaults>
</compile_context>

<pallas_src>
import functools

import jax
import jax.numpy as jnp
from jax.experimental import pallas as pl
from jax.experimental.pallas import tpu as pltpu

_NEG_BIG = -1e30   # bias for padded action lanes -> softmax prob exactly 0
_LANE = 128


def _round_up(n, m):
    return ((n + m - 1) // m) * m


def actor_kernel(x_ref, w1_ref, b1_ref, w2_ref, b2_ref, w3_ref, b3_ref, out_ref):
    a_dim = out_ref.shape[-1]

    # f32 -> bf16 cast in-kernel (cheap VPU pack; avoids an extra HBM pass).
    x = x_ref[...].astype(jnp.bfloat16)

    # linear1 + relu: bf16 MXU inputs, f32 accumulation; bias/relu in f32.
    h1 = jnp.dot(x, w1_ref[...], preferred_element_type=jnp.float32) + b1_ref[...]
    h1 = jnp.maximum(h1, 0.0).astype(jnp.bfloat16)

    # linear2 + relu
    h2 = jnp.dot(h1, w2_ref[...], preferred_element_type=jnp.float32) + b2_ref[...]
    h2 = jnp.maximum(h2, 0.0).astype(jnp.bfloat16)

    # linear3 on the lane-padded (128-wide) W3; padded lanes carry bias -1e30
    # so exp() flushes them to exactly 0.  Softmax math stays in f32
    # (v5e has no bf16 VPU/EUP datapath anyway).
    logits = jnp.dot(h2, w3_ref[...], preferred_element_type=jnp.float32) + b3_ref[...]
    m = jnp.max(logits, axis=-1, keepdims=True)
    e = jnp.exp(logits - m)
    probs = e * pl.reciprocal(jnp.sum(e, axis=-1, keepdims=True), approx=False)

    # Store only the real actions: (tb, a_dim) -> 16x less HBM writeback than
    # the padded 128-lane block.
    out_ref[...] = probs[:, :a_dim]


def prepare_actor_params(params):
    """One-time parameter prep (call OUTSIDE the per-step path):
    bf16 MXU weights, f32 biases, W3/b3 lane-padded to 128."""
    w1, b1, w2, b2, w3, b3 = params
    a_dim = w3.shape[1]
    pad = _round_up(a_dim, _LANE) - a_dim
    w3p = jnp.pad(w3, ((0, 0), (0, pad)))
    b3p = jnp.pad(b3, ((0, 0), (0, pad)), constant_values=_NEG_BIG)  # keep f32!
    prepped = (
        w1.astype(jnp.bfloat16), b1.astype(jnp.float32),
        w2.astype(jnp.bfloat16), b2.astype(jnp.float32),
        w3p.astype(jnp.bfloat16), b3p.astype(jnp.float32),
    )
    return prepped, a_dim


def _choose_tile(B, tile_b):
    """Batch tile: rounded to 16 rows (bf16 sublane packing), minimal padding
    waste, and >= 2 grid steps when B > 128 (so v7x can use both TCs)."""
    if B <= 128:
        return _round_up(B, 16)
    n_steps = max(2, -(-B // tile_b))          # ceil-div, at least 2 steps
    return _round_up(-(-B // n_steps), 16)


@functools.partial(jax.jit, static_argnames=("a_dim", "tile_b"))
def actor_forward(x, prepped, a_dim, *, tile_b=512):
    """x: [B, s_dim] float32 -> softmax probs [B, a_dim] float32."""
    w1, b1, w2, b2, w3p, b3p = prepped
    B, s_dim = x.shape
    h_dim = w1.shape[1]
    a_pad = w3p.shape[1]

    tb = _choose_tile(B, tile_b)
    grid = (pl.cdiv(B, tb),)     # partial boundary block is clipped by Pallas

    const = lambda i: (0, 0)     # weights/biases: same block every grid step

    out = pl.pallas_call(
        actor_kernel,
        out_shape=jax.ShapeDtypeStruct((B, a_dim), jnp.float32),
        grid_spec=pltpu.PrefetchScalarGridSpec(
            num_scalar_prefetch=0,
            grid=grid,
            in_specs=[
                pl.BlockSpec((tb, s_dim), lambda i: (i, 0)),   # x tile   (f32)
                pl.BlockSpec((s_dim, h_dim), const),           # W1       (bf16)
                pl.BlockSpec((1, h_dim), const),               # b1       (f32)
                pl.BlockSpec((h_dim, h_dim), const),           # W2       (bf16)
                pl.BlockSpec((1, h_dim), const),               # b2       (f32)
                pl.BlockSpec((h_dim, a_pad), const),           # W3 pad   (bf16)
                pl.BlockSpec((1, a_pad), const),               # b3 pad   (f32)
            ],
            out_specs=pl.BlockSpec((tb, a_dim), lambda i: (i, 0)),
        ),
        compiler_params=pltpu.CompilerParams(
            dimension_semantics=("parallel",),
        ),
    )(x, w1, b1, w2, b2, w3p, b3p)

    return out


def init_actor_params(key, s_dim, a_dim, h_dim):
    """Deterministic init mimicking torch.nn.Linear default (U[-1/sqrt(fan_in), +])."""
    ks = jax.random.split(key, 6)

    def lin(kw, kb, fan_in, fan_out):
        bound = 1.0 / jnp.sqrt(fan_in)
        w = jax.random.uniform(kw, (fan_in, fan_out), jnp.float32, -bound, bound)
        b = jax.random.uniform(kb, (1, fan_out), jnp.float32, -bound, bound)
        return w, b

    w1, b1 = lin(ks[0], ks[1], s_dim, h_dim)
    w2, b2 = lin(ks[2], ks[3], h_dim, h_dim)
    w3, b3 = lin(ks[4], ks[5], h_dim, a_dim)
    return (w1, b1, w2, b2, w3, b3)


def actor_forward_ref(x, params):
    """Pure-JAX f32 reference of the PyTorch forward."""
    w1, b1, w2, b2, w3, b3 = params
    h1 = jnp.maximum(x @ w1 + b1, 0.0)
    h2 = jnp.maximum(h1 @ w2 + b2, 0.0)
    return jax.nn.softmax(h2 @ w3 + b3, axis=-1)


def actor_forward_ref_bf16(x, params):
    """Reference mirroring the kernel's bf16-input / f32-accumulate path."""
    w1, b1, w2, b2, w3, b3 = params
    rd = lambda a: a.astype(jnp.bfloat16).astype(jnp.float32)
    h1 = jnp.maximum(rd(x) @ rd(w1) + b1, 0.0)
    h2 = jnp.maximum(rd(h1) @ rd(w2) + b2, 0.0)
    return jax.nn.softmax(rd(h2) @ rd(w3) + b3, axis=-1)


if __name__ == "__main__":
    key = jax.random.PRNGKey(0)
    k_x, k_p, k_x2 = jax.random.split(key, 3)

    # Small shapes implied by the module: state dim 16, hidden 128, 8 actions.
    s_dim, h_dim, a_dim = 16, 128, 8
    params = init_actor_params(k_p, s_dim, a_dim, h_dim)
    prepped, a_dim_out = prepare_actor_params(params)

    # --- case 1: tiny batch (B=30) exercises the single-step / partial-block path
    B1 = 30
    x1 = jax.random.normal(k_x, (B1, s_dim), dtype=jnp.float32)
    probs1 = jax.block_until_ready(actor_forward(x1, prepped, a_dim_out))
    assert probs1.shape == (B1, a_dim)
    assert jnp.allclose(jnp.sum(probs1, axis=-1), 1.0, atol=1e-5)
    assert jnp.allclose(probs1, actor_forward_ref_bf16(x1, params), atol=3e-3, rtol=3e-3)
    assert jnp.allclose(probs1, actor_forward_ref(x1, params), atol=3e-2)

    # --- case 2: larger batch (B=300) exercises the multi-step grid + clipping
    B2 = 300
    x2 = jax.random.normal(k_x2, (B2, s_dim), dtype=jnp.float32)
    probs2 = jax.block_until_ready(actor_forward(x2, prepped, a_dim_out))
    assert probs2.shape == (B2, a_dim)
    assert jnp.allclose(jnp.sum(probs2, axis=-1), 1.0, atol=1e-5)
    assert jnp.allclose(probs2, actor_forward_ref_bf16(x2, params), atol=3e-3, rtol=3e-3)
    assert jnp.allclose(probs2, actor_forward_ref(x2, params), atol=3e-2)

    print("KERNEL_OK")
</pallas_src>

<mosaic_0001>
module attributes {stable_mosaic.version = 11 : i64} {
  func.func @actor_kernel(%arg0: i32, %arg1: memref<32x16xf32, #tpu.memory_space<vmem>>, %arg2: memref<16x128xbf16, #tpu.memory_space<vmem>>, %arg3: memref<1x128xf32, #tpu.memory_space<vmem>>, %arg4: memref<128x128xbf16, #tpu.memory_space<vmem>>, %arg5: memref<1x128xf32, #tpu.memory_space<vmem>>, %arg6: memref<128x128xbf16, #tpu.memory_space<vmem>>, %arg7: memref<1x128xf32, #tpu.memory_space<vmem>>, %arg8: memref<32x8xf32, #tpu.memory_space<vmem>>) attributes {dimension_semantics = [#tpu.dimension_semantics<parallel>], iteration_bounds = array<i64: 1>, scalar_prefetch = 0 : i64, scratch_operands = 0 : i64, tpu.core_type = #tpu.core_type<tc>, window_params = [{transform_indices = @transform_0, window_bounds = array<i64: 32, 16>}, {pipeline_mode = #tpu.pipeline_mode<synchronous>, transform_indices = @transform_1, window_bounds = array<i64: 16, 128>}, {pipeline_mode = #tpu.pipeline_mode<synchronous>, transform_indices = @transform_2, window_bounds = array<i64: 1, 128>}, {pipeline_mode = #tpu.pipeline_mode<synchronous>, transform_indices = @transform_3, window_bounds = array<i64: 128, 128>}, {pipeline_mode = #tpu.pipeline_mode<synchronous>, transform_indices = @transform_4, window_bounds = array<i64: 1, 128>}, {pipeline_mode = #tpu.pipeline_mode<synchronous>, transform_indices = @transform_5, window_bounds = array<i64: 128, 128>}, {pipeline_mode = #tpu.pipeline_mode<synchronous>, transform_indices = @transform_6, window_bounds = array<i64: 1, 128>}, {transform_indices = @transform_7, window_bounds = array<i64: 32, 8>}]} {
    %c0 = arith.constant 0 : index
    %c0_0 = arith.constant 0 : index
    %0 = vector.load %arg1[%c0, %c0_0] : memref<32x16xf32, #tpu.memory_space<vmem>>, vector<32x16xf32>
    %1 = arith.truncf %0 : vector<32x16xf32> to vector<32x16xbf16>
    %c0_1 = arith.constant 0 : index
    %c0_2 = arith.constant 0 : index
    %2 = vector.load %arg2[%c0_1, %c0_2] : memref<16x128xbf16, #tpu.memory_space<vmem>>, vector<16x128xbf16>
    %cst = arith.constant dense<0.000000e+00> : vector<32x128xf32>
    %3 = tpu.matmul %1, %2, %cst {dimension_numbers = #tpu.dot_dimension_numbers<[1], [0], [0], [1], [0, 0, 1, 1], [], []>} : vector<32x16xbf16>, vector<16x128xbf16>, vector<32x128xf32> -> vector<32x128xf32>
    %c0_3 = arith.constant 0 : index
    %c0_4 = arith.constant 0 : index
    %4 = vector.load %arg3[%c0_3, %c0_4] : memref<1x128xf32, #tpu.memory_space<vmem>>, vector<1x128xf32>
    %5 = vector.broadcast %4 : vector<1x128xf32> to vector<32x128xf32>
    %6 = arith.addf %3, %5 : vector<32x128xf32>
    %cst_5 = arith.constant 0.000000e+00 : f32
    %7 = vector.broadcast %cst_5 : f32 to vector<32x128xf32>
    %8 = arith.maximumf %6, %7 : vector<32x128xf32>
    %9 = arith.truncf %8 : vector<32x128xf32> to vector<32x128xbf16>
    %c0_6 = arith.constant 0 : index
    %c0_7 = arith.constant 0 : index
    %10 = vector.load %arg4[%c0_6, %c0_7] : memref<128x128xbf16, #tpu.memory_space<vmem>>, vector<128x128xbf16>
    %cst_8 = arith.constant dense<0.000000e+00> : vector<32x128xf32>
    %11 = tpu.matmul %9, %10, %cst_8 {dimension_numbers = #tpu.dot_dimension_numbers<[1], [0], [0], [1], [0, 0, 1, 1], [], []>} : vector<32x128xbf16>, vector<128x128xbf16>, vector<32x128xf32> -> vector<32x128xf32>
    %c0_9 = arith.constant 0 : index
    %c0_10 = arith.constant 0 : index
    %12 = vector.load %arg5[%c0_9, %c0_10] : memref<1x128xf32, #tpu.memory_space<vmem>>, vector<1x128xf32>
    %13 = vector.broadcast %12 : vector<1x128xf32> to vector<32x128xf32>
    %14 = arith.addf %11, %13 : vector<32x128xf32>
    %cst_11 = arith.constant 0.000000e+00 : f32
    %15 = vector.broadcast %cst_11 : f32 to vector<32x128xf32>
    %16 = arith.maximumf %14, %15 : vector<32x128xf32>
    %17 = arith.truncf %16 : vector<32x128xf32> to vector<32x128xbf16>
    %c0_12 = arith.constant 0 : index
    %c0_13 = arith.constant 0 : index
    %18 = vector.load %arg6[%c0_12, %c0_13] : memref<128x128xbf16, #tpu.memory_space<vmem>>, vector<128x128xbf16>
    %cst_14 = arith.constant dense<0.000000e+00> : vector<32x128xf32>
    %19 = tpu.matmul %17, %18, %cst_14 {dimension_numbers = #tpu.dot_dimension_numbers<[1], [0], [0], [1], [0, 0, 1, 1], [], []>} : vector<32x128xbf16>, vector<128x128xbf16>, vector<32x128xf32> -> vector<32x128xf32>
    %c0_15 = arith.constant 0 : index
    %c0_16 = arith.constant 0 : index
    %20 = vector.load %arg7[%c0_15, %c0_16] : memref<1x128xf32, #tpu.memory_space<vmem>>, vector<1x128xf32>
    %21 = vector.broadcast %20 : vector<1x128xf32> to vector<32x128xf32>
    %22 = arith.addf %19, %21 : vector<32x128xf32>
    %cst_17 = arith.constant dense<0xFF800000> : vector<32xf32>
    %23 = vector.multi_reduction <maximumf>, %22, %cst_17 [1] : vector<32x128xf32> to vector<32xf32>
    %24 = vector.shape_cast %23 : vector<32xf32> to vector<32x1xf32>
    %25 = vector.broadcast %24 : vector<32x1xf32> to vector<32x128xf32>
    %26 = arith.subf %22, %25 : vector<32x128xf32>
    %27 = math.exp %26 : vector<32x128xf32>
    %cst_18 = arith.constant dense<0.000000e+00> : vector<32xf32>
    %28 = vector.multi_reduction <add>, %27, %cst_18 [1] : vector<32x128xf32> to vector<32xf32>
    %29 = vector.shape_cast %28 : vector<32xf32> to vector<32x1xf32>
    %30 = tpu.reciprocal %29 : vector<32x1xf32> -> vector<32x1xf32>
    %31 = vector.broadcast %30 : vector<32x1xf32> to vector<32x128xf32>
    %32 = arith.mulf %27, %31 : vector<32x128xf32>
    %33 = vector.extract_strided_slice %32 {offsets = [0, 0], sizes = [32, 8], strides = [1, 1]} : vector<32x128xf32> to vector<32x8xf32>
    %c0_19 = arith.constant 0 : index
    %c0_20 = arith.constant 0 : index
    %34 = vector.load %arg8[%c0_19, %c0_20] : memref<32x8xf32, #tpu.memory_space<vmem>>, vector<32x8xf32>
    tpu.vector_store %arg8[%c0_19, %c0_20], %33 {strides = array<i32>} : memref<32x8xf32, #tpu.memory_space<vmem>>, vector<32x8xf32>,
    return
  }
  func.func @transform_0(%arg0: i32) -> (i32, i32) {
    %c0_i32 = arith.constant 0 : i32
    %c0_i32_0 = arith.constant 0 : i32
    return %arg0, %c0_i32 : i32, i32
  }
  func.func @transform_1(%arg0: i32) -> (i32, i32) {
    %c0_i32 = arith.constant 0 : i32
    %c0_i32_0 = arith.constant 0 : i32
    %c0_i32_1 = arith.constant 0 : i32
    return %c0_i32, %c0_i32_0 : i32, i32
  }
  func.func @transform_2(%arg0: i32) -> (i32, i32) {
    %c0_i32 = arith.constant 0 : i32
    %c0_i32_0 = arith.constant 0 : i32
    %c0_i32_1 = arith.constant 0 : i32
    return %c0_i32, %c0_i32_0 : i32, i32
  }
  func.func @transform_3(%arg0: i32) -> (i32, i32) {
    %c0_i32 = arith.constant 0 : i32
    %c0_i32_0 = arith.constant 0 : i32
    %c0_i32_1 = arith.constant 0 : i32
    return %c0_i32, %c0_i32_0 : i32, i32
  }
  func.func @transform_4(%arg0: i32) -> (i32, i32) {
    %c0_i32 = arith.constant 0 : i32
    %c0_i32_0 = arith.constant 0 : i32
    %c0_i32_1 = arith.constant 0 : i32
    return %c0_i32, %c0_i32_0 : i32, i32
  }
  func.func @transform_5(%arg0: i32) -> (i32, i32) {
    %c0_i32 = arith.constant 0 : i32
    %c0_i32_0 = arith.constant 0 : i32
    %c0_i32_1 = arith.constant 0 : i32
    return %c0_i32, %c0_i32_0 : i32, i32
  }
  func.func @transform_6(%arg0: i32) -> (i32, i32) {
    %c0_i32 = arith.constant 0 : i32
    %c0_i32_0 = arith.constant 0 : i32
    %c0_i32_1 = arith.constant 0 : i32
    return %c0_i32, %c0_i32_0 : i32, i32
  }
  func.func @transform_7(%arg0: i32) -> (i32, i32) {
    %c0_i32 = arith.constant 0 : i32
    %c0_i32_0 = arith.constant 0 : i32
    return %arg0, %c0_i32 : i32, i32
  }
}

</mosaic_0001>

<bundles_post_ra>
// kernel: actor_forward.1
= control target key start
LH: loop header
LB: loop body
LE: loop exit
PB: predicated region body
PF: predicated region fallthrough
CT: control target
= control target key end

     0   :  { %12 = vsyncpa [#allocation3], 0  ;;  %s732_s0 = inlined_call_operand.vmem [shape: f32[30,16], index: 0, kind: input, shape index: {}]   ;;  %s733_s1 = inlined_call_operand.hbm [shape: bf16[16,128], index: 1, kind: input, shape index: {}]   ;;  %s734_s2 = inlined_call_operand.vmem [shape: f32[1,128], index: 2, kind: input, shape index: {}]   ;;  %s735_s3 = inlined_call_operand.hbm [shape: bf16[128,128], index: 3, kind: input, shape index: {}]   ;;  %s736_s4 = inlined_call_operand.vmem [shape: f32[1,128], index: 4, kind: input, shape index: {}]   ;;  %s737_s5 = inlined_call_operand.vmem [shape: bf16[128,128], index: 5, kind: input, shape index: {}]   ;;  %s738_s6 = inlined_call_operand.vmem [shape: f32[1,128], index: 6, kind: input, shape index: {}]   ;;  %s739_s7 = inlined_call_operand.vmem [shape: f32[30,8], index: 7, kind: output, shape index: {}]  }
   0x1   :  { %13 = vsyncpa [#allocation5], 0  ;;  %s607_s24 = smov [#allocation2]   ;;  %s559_s28 = scalar_lea.hbm %s733_s1, 128 }
   0x2   :  { %s21_s25 = sshll.u32 %s607_s24, 4  ;;  %p560_p0 = scmp.ne.s32.totalorder %s733_s1, %s559_s28  ;;  %s22_s25 = int_to_ptr.vmem [resolvable:$true] %s21_s25 }
   0x3   :  { %p563_p1 = scmp.lt.u32.totalorder %s559_s28, %s733_s1 }
   0x5   :  { %p565_p2 = pnand %p563_p1, %p560_p0 }
   0x7   :  { %568 = shalt.err (!%p565_p2)
}
   0x8   :  { %s569_s10 = scalar_lea.vmem %s22_s25, 128  ;;  %p574_p4 = scmp.lt.s32.totalorder %s22_s25, %s22_s25 }
   0x9   :  { %p570_p3 = scmp.ne.s32.totalorder %s22_s25, %s569_s10  ;;  %p575_p5 = scmp.lt.s32.totalorder %s569_s10, %s569_s10 }
   0xb   :  { %p576_p6 = por %p575_p5, %p574_p4 }
   0xd   :  { %p577_p7 = pnand %p576_p6, %p570_p3 }
   0xf   :  { %580 = shalt.err (!%p577_p7)
}
  0x10   :  { %s608_s11 = smov 64   ;;  %s609_s12 = smov 4  }
  0x11   :  { %27 = dma.hbm_to_vmem [thread:$0]  %s733_s1, 128, %s22_s25, [#allocation3], %s608_s11, %s608_s11, %s609_s12  }
  0x12   :  { %s610_s15 = smov [#allocation4]   ;;  %s581_s19 = scalar_lea.hbm %s735_s3, 1024 }
  0x13   :  { %s35_s16 = sshll.u32 %s610_s15, 4  ;;  %p582_p8 = scmp.ne.s32.totalorder %s735_s3, %s581_s19  ;;  %s36_s16 = int_to_ptr.vmem [resolvable:$true] %s35_s16 }
  0x14   :  { %p585_p9 = scmp.lt.u32.totalorder %s581_s19, %s735_s3 }
  0x16   :  { %p587_p10 = pnand %p585_p9, %p582_p8 }
  0x18   :  { %590 = shalt.err (!%p587_p10)
}
  0x19   :  { %s591_s24 = scalar_lea.vmem %s36_s16, 1024  ;;  %p596_p12 = scmp.lt.s32.totalorder %s36_s16, %s36_s16 }
  0x1a   :  { %p592_p11 = scmp.ne.s32.totalorder %s36_s16, %s591_s24  ;;  %p597_p13 = scmp.lt.s32.totalorder %s591_s24, %s591_s24 }
  0x1c   :  { %p598_p0 = por %p597_p13, %p596_p12 }
  0x1e   :  { %p599_p1 = pnand %p598_p0, %p592_p11 }
  0x20   :  { %602 = shalt.err (!%p599_p1)
}
  0x21   :  { %41 = dma.hbm_to_vmem [thread:$0]  %s735_s3, 1024, %s36_s16, [#allocation5], %s608_s11, %s608_s11, %s609_s12  }
  0x22   :  { %603 = dma.done.wait [#allocation3], 128  }
  0x23   :  { %604 = vsyncadd [#allocation3], 4294967168 }
  0x24   :  { %605 = dma.done.wait [#allocation5], 1024  }
  0x25   :  { %606 = vsyncadd [#allocation5], 4294966272  ;;  %v526_v0 = vld [vmem:[#allocation2] sm:$0xff]   ;;  %v56_v2 = vld [vmem:[%s732_s0 + $0x8] sm:$0xff]  ;;  %vm76_vm0 = vcmask 130048   ;;  %vm420_vm1 = vcmask 64512  }
  0x26   :  { %v55_v1 = vld [vmem:[%s732_s0] sm:$0xff]  ;;  %v57_v3 = vld [vmem:[%s732_s0 + $0x10] sm:$0xff]  ;;  %476 = vmatprep.subr.bf16.mxu0 %v526_v0  ;;  %v58_v5 = vld [vmem:[%s732_s0 + $0x18] sm:$0xff] }
  0x27   :  { %v59_v4 = vpack.c.bf16 %v56_v2, %v55_v1  ;;  %477 = vmatpush3.bf16.msra.mxu0 %v526_v0  ;;  %v60_v6 = vpack.c.bf16 %v58_v5, %v57_v3  ;;  %v527_v7 = vld [vmem:[#allocation4] sm:$0xff]   ;;  %v528_v8 = vld [vmem:[#allocation4 + $0x8] sm:$0xff]   ;;  %v529_v9 = vld [vmem:[#allocation4 + $0x10] sm:$0xff]  }
  0x28   :  { %482 = vmatprep.subr.bf16.mxu1 %v527_v7  ;;  %v530_v10 = vld [vmem:[#allocation4 + $0x18] sm:$0xff]   ;;  %v531_v11 = vld [vmem:[#allocation4 + $0x20] sm:$0xff]   ;;  %v532_v12 = vld [vmem:[#allocation4 + $0x28] sm:$0xff]  }
  0x29   :  { %478 = vmatprep.mubr.msk.bf16.mxu0 %vm76_vm0, %v59_v4  ;;  %483 = vmatpush3.bf16.msra.mxu1 %v527_v7  ;;  %v533_v13 = vld [vmem:[#allocation4 + $0x30] sm:$0xff]   ;;  %v534_v14 = vld [vmem:[#allocation4 + $0x38] sm:$0xff]   ;;  %v536_v16 = vld [vmem:[%s737_s5 + $0x8] sm:$0xff]  }
  0x2a   :  { %479 = vmatmul.mubr.msk.bf16.vlgmr.msra.gmra.mrb[0].mxu0 %vm76_vm0, %v60_v6  ;;  %484 = vmatprep.subr.bf16.mxu1 %v528_v8  ;;  %v535_v15 = vld [vmem:[%s737_s5] sm:$0xff]   ;;  %v537_v17 = vld [vmem:[%s737_s5 + $0x10] sm:$0xff]   ;;  %v538_v18 = vld [vmem:[%s737_s5 + $0x18] sm:$0xff]  }
  0x2b   :  { %502 = vmatprep.subr.bf16.mxu0 %v535_v15  ;;  %v539_v19 = vld [vmem:[%s737_s5 + $0x20] sm:$0xff]   ;;  %v540_v20 = vld [vmem:[%s737_s5 + $0x28] sm:$0xff]   ;;  %v541_v36 = vld [vmem:[%s737_s5 + $0x30] sm:$0xff]  }
  0x2c   :  { %503 = vmatpush3.bf16.msra.mxu0 %v535_v15  ;;  %v431_v21 = vld [vmem:[%s734_s2] ss:$0 sm:$0xff]  ;;  %v542_v37 = vld [vmem:[%s737_s5 + $0x38] sm:$0xff]  }
  0x2d   :  { %485 = vmatpush3.bf16.msra.mxu1 %v528_v8  ;;  %504 = vmatprep.subr.bf16.mxu0 %v536_v16  ;;  %v435_v38 = vld [vmem:[%s736_s4] ss:$0 sm:$0xff] }
  0x2e   :  { %486 = vmatprep.subr.bf16.mxu1 %v529_v9  ;;  %v444_v53 = vld [vmem:[%s738_s6] ss:$0 sm:$0xff] }
  0x30   :  { %505 = vmatpush3.bf16.msra.mxu0 %v536_v16 }
  0x31   :  { %487 = vmatpush3.bf16.msra.mxu1 %v529_v9  ;;  %506 = vmatprep.subr.bf16.mxu0 %v537_v17 }
  0x32   :  { %488 = vmatprep.subr.bf16.mxu1 %v530_v10 }
  0x34   :  { %507 = vmatpush3.bf16.msra.mxu0 %v537_v17 }
  0x35   :  { %489 = vmatpush3.bf16.msra.mxu1 %v530_v10  ;;  %508 = vmatprep.subr.bf16.mxu0 %v538_v18 }
  0x36   :  { %490 = vmatprep.subr.bf16.mxu1 %v531_v11 }
  0x38   :  { %509 = vmatpush3.bf16.msra.mxu0 %v538_v18 }
  0x39   :  { %491 = vmatpush3.bf16.msra.mxu1 %v531_v11  ;;  %510 = vmatprep.subr.bf16.mxu0 %v539_v19 }
  0x3a   :  { %492 = vmatprep.subr.bf16.mxu1 %v532_v12 }
  0x3c   :  { %511 = vmatpush3.bf16.msra.mxu0 %v539_v19 }
  0x3d   :  { %493 = vmatpush3.bf16.msra.mxu1 %v532_v12  ;;  %512 = vmatprep.subr.bf16.mxu0 %v540_v20 }
  0x3e   :  { %494 = vmatprep.subr.bf16.mxu1 %v533_v13 }
  0x40   :  { %513 = vmatpush3.bf16.msra.mxu0 %v540_v20 }
  0x41   :  { %495 = vmatpush3.bf16.msra.mxu1 %v533_v13  ;;  %514 = vmatprep.subr.bf16.mxu0 %v541_v36 }
  0x42   :  { %496 = vmatprep.subr.bf16.mxu1 %v534_v14 }
  0x44   :  { %515 = vmatpush3.bf16.msra.mxu0 %v541_v36 }
  0x45   :  { %497 = vmatpush3.bf16.msra.mxu1 %v534_v14  ;;  %516 = vmatprep.subr.bf16.mxu0 %v542_v37 }
  0x48   :  { %517 = vmatpush3.bf16.msra.mxu0 %v542_v37 }
  0xfd   :  { %v480_v22 = vpop.f32.mrb[0].mxu0 }
  0xfe   :  { %v126_v23 = vadd.f32 %v480_v22, %v431_v21  ;;  %v117_v24 = vpop.f32.mrb[1].mxu0 }
  0xff   :  { %v118_v25 = vadd.f32 %v431_v21, %v117_v24  ;;  %v481_v26 = vpop.f32.mrb[2].mxu0 }
 0x100   :  { %v129_v27 = vadd.f32 %v481_v26, %v431_v21  ;;  %v120_v28 = vpop.f32.mrb[3].mxu0  ;;  %v134_v30 = vmax.f32 %v126_v23, 0.0 }
 0x101   :  { %v121_v29 = vadd.f32 %v431_v21, %v120_v28  ;;  %v132_v32 = vmax.f32 %v118_v25, 0.0 }
 0x102   :  { %v135_v31 = vmax.f32 %v129_v27, 0.0 }
 0x103   :  { %v133_v33 = vmax.f32 %v121_v29, 0.0 }
 0x104   :  { %v137_v34 = vpack.c.bf16 %v135_v31, %v134_v30 }
 0x105   :  { %v136_v35 = vpack.c.bf16 %v133_v33, %v132_v32 }
 0x107   :  { %498 = vmatprep.mubr.bf16.mxu1 %v136_v35 }
 0x108   :  { %499 = vmatmul.mubr.bf16.vlgmr.msra.gmra.mrb[0].mxu1 %v137_v34 }
 0x1db   :  { %v500_v39 = vpop.f32.mrb[0].mxu1 }
 0x1dc   :  { %v252_v40 = vadd.f32 %v500_v39, %v435_v38  ;;  %v243_v41 = vpop.f32.mrb[1].mxu1 }
 0x1dd   :  { %v244_v42 = vadd.f32 %v435_v38, %v243_v41  ;;  %v501_v43 = vpop.f32.mrb[2].mxu1 }
 0x1de   :  { %v255_v44 = vadd.f32 %v501_v43, %v435_v38  ;;  %v246_v45 = vpop.f32.mrb[3].mxu1  ;;  %v260_v47 = vmax.f32 %v252_v40, 0.0 }
 0x1df   :  { %v247_v46 = vadd.f32 %v435_v38, %v246_v45  ;;  %v258_v49 = vmax.f32 %v244_v42, 0.0 }
 0x1e0   :  { %v261_v48 = vmax.f32 %v255_v44, 0.0 }
 0x1e1   :  { %v259_v50 = vmax.f32 %v247_v46, 0.0 }
 0x1e2   :  { %v263_v51 = vpack.c.bf16 %v261_v48, %v260_v47 }
 0x1e3   :  { %v262_v52 = vpack.c.bf16 %v259_v50, %v258_v49 }
 0x1e5   :  { %518 = vmatprep.mubr.bf16.mxu0 %v262_v52 }
 0x1e6   :  { %519 = vmatmul.mubr.bf16.vlgmr.msra.gmra.mrb[4].mxu0 %v263_v51 }
 0x2b9   :  { %v520_v54 = vpop.f32.mrb[4].mxu0 }
 0x2ba   :  { %v378_v55 = vadd.f32 %v520_v54, %v444_v53  ;;  %v369_v56 = vpop.f32.mrb[5].mxu0 }
 0x2bb   :  { %v370_v57 = vadd.f32 %v444_v53, %v369_v56  ;;  %v521_v58 = vpop.f32.mrb[6].mxu0 }
 0x2bc   :  { %388 = vmax.xlane.f32.xlu1 %v378_v55  ;;  %v372_v59 = vpop.f32.mrb[7].mxu0  ;;  %v381_v60 = vadd.f32 %v521_v58, %v444_v53 }
 0x2bd   :  { %384 = vmax.xlane.f32.xlu0 %v370_v57  ;;  %v373_v61 = vadd.f32 %v444_v53, %v372_v59 }
 0x2c0   :  { %390 = vmax.xlane.f32.xlu1 %v381_v60 }
 0x2c1   :  { %386 = vmax.xlane.f32.xlu0 %v373_v61 }
 0x349   :  { %v389_v62 = vpop.xlane.xlu1 %388 }
 0x34a   :  { %v394_v63 = vsub.f32 %v378_v55, %v389_v62  ;;  %v385_v0 = vpop.xlane.xlu0 %384 }
 0x34b   :  { %v392_v1 = vsub.f32 %v370_v57, %v385_v0 }
 0x34c   :  { %v400_v4 = vmul.f32 1.442695, %v394_v63 }
 0x34d   :  { %v396_v2 = vmul.f32 1.442695, %v392_v1  ;;  %v391_v3 = vpop.xlane.xlu1 %390 }
 0x34e   :  { %v387_v5 = vpop.xlane.xlu0 %386  ;;  %v395_v6 = vsub.f32 %v381_v60, %v391_v3 }
 0x34f   :  { %543 = vpow2.f32 %v396_v2  ;;  %v393_v7 = vsub.f32 %v373_v61, %v387_v5 }
 0x350   :  { %545 = vpow2.f32 %v400_v4  ;;  %v402_v9 = vmul.f32 1.442695, %v395_v6 }
 0x351   :  { %v398_v8 = vmul.f32 1.442695, %v393_v7 }
 0x353   :  { %547 = vpow2.f32 %v398_v8 }
 0x354   :  { %549 = vpow2.f32 %v402_v9 }
 0x359   :  { %v544_v10 = vpop.eup %543 }
 0x35a   :  { %404 = vadd.xlane.f32.xlu0 %v544_v10  ;;  %v546_v11 = vpop.eup %545 }
 0x35d   :  { %v548_v12 = vpop.eup %547 }
 0x35e   :  { %408 = vadd.xlane.f32.xlu0 %v546_v11  ;;  %406 = vadd.xlane.f32.xlu1 %v548_v12  ;;  %v550_v13 = vpop.eup %549 }
 0x362   :  { %410 = vadd.xlane.f32.xlu1 %v550_v13 }
 0x3e7   :  { %v405_v14 = vpop.xlane.xlu0 %404 }
 0x3e8   :  { %551 = vrcp.f32 %v405_v14 }
 0x3eb   :  { %v407_v15 = vpop.xlane.xlu1 %406  ;;  %v409_v16 = vpop.xlane.xlu0 %408 }
 0x3ec   :  { %553 = vrcp.f32 %v407_v15 }
 0x3ed   :  { %555 = vrcp.f32 %v409_v16 }
 0x3ef   :  { %v411_v17 = vpop.xlane.xlu1 %410 }
 0x3f0   :  { %557 = vrcp.f32 %v411_v17 }
 0x3f2   :  { %v552_v18 = vpop.eup %551 }
 0x3f3   :  { %v416_v19 = vmul.f32 %v552_v18, %v544_v10 }
 0x3f5   :  { %421 = vst.msk [vmem:[%s739_s7] sm:$0xff] %vm420_vm1, %v416_v19 }
 0x3f6   :  { %v554_v20 = vpop.eup %553 }
 0x3f7   :  { %v556_v21 = vpop.eup %555  ;;  %v417_v22 = vmul.f32 %v554_v20, %v548_v12 }
 0x3f8   :  { %v418_v23 = vmul.f32 %v556_v21, %v546_v11 }
 0x3f9   :  { %422 = vst.msk [vmem:[%s739_s7 + $0x8] sm:$0xff] %vm420_vm1, %v417_v22 }
 0x3fa   :  { %v558_v24 = vpop.eup %557  ;;  %423 = vst.msk [vmem:[%s739_s7 + $0x10] sm:$0xff] %vm420_vm1, %v418_v23 }
 0x3fb   :  { %v419_v25 = vmul.f32 %v558_v24, %v550_v13 }
 0x3fd   :  { %424 = vst.msk [vmem:[%s739_s7 + $0x18] sm:$0xff] %vm420_vm1, %v419_v25 }
 0x3fe   :  { %429 = vsyncpa [#allocation3], 1 }
 0x3ff   :  { %430 = vsyncpa [#allocation5], 1 }

</bundles_post_ra>
